<compile_context>
chip_gen: v7x
topology: tpu7x:2x2x1
jax: 0.10.0
libtpu: 0.0.40
codegen_flags: <defaults>
</compile_context>

<pallas_src>
import math

import jax
import jax.numpy as jnp
from jax.experimental import pallas as pl
from jax.experimental.pallas import tpu as pltpu

_LANE = 128
_TARGET_BLOCK_BYTES = 4 * 1024 * 1024   # ~4 MiB per block buffer
_MAX_LANE_WIDTH = 8192                  # widest last-dim slab we form
# 2 inputs + 1 output, double-buffered -> 6 x ~4 MiB = ~24 MiB worst case.
# 40 MiB fits inside v7x's 64 MiB physical VMEM with headroom and raises the
# 16/32 MiB scoped defaults on v5e/v6e.
_VMEM_LIMIT_BYTES = 40 * 1024 * 1024


def _res_gate_kernel(x_ref, y_ref, o_ref):
    # Elementwise residual add on the current VMEM tile (VPU).
    o_ref[...] = x_ref[...] + y_ref[...]


def _sublane(itemsize: int) -> int:
    # Sub-32-bit dtypes pack along sublanes: f32 -> 8, bf16 -> 16, int8/fp8 -> 32.
    return max(8, 32 // itemsize)


def _pick_tile_rows(n_rows: int, width: int, itemsize: int) -> int:
    # Whole slab fits one block buffer -> single block (block dims == full array
    # dims satisfies the (8,128) rule and avoids partial-block masking).
    if n_rows * width * itemsize <= _TARGET_BLOCK_BYTES:
        return n_rows
    sub = _sublane(itemsize)
    rows_for_target = max(1, _TARGET_BLOCK_BYTES // (width * itemsize))
    tile = min(n_rows, rows_for_target)
    # Round down to a multiple of the sublane packing.
    return max(sub, (tile // sub) * sub)


def _add_2d(x2: jax.Array, y2: jax.Array, tile_rows: int) -> jax.Array:
    rows, width = x2.shape
    grid = (pl.cdiv(rows, tile_rows),)
    return pl.pallas_call(
        _res_gate_kernel,
        out_shape=jax.ShapeDtypeStruct((rows, width), x2.dtype),
        grid_spec=pltpu.PrefetchScalarGridSpec(
            num_scalar_prefetch=0,
            grid=grid,
            in_specs=[
                pl.BlockSpec((tile_rows, width), lambda i: (i, 0)),
                pl.BlockSpec((tile_rows, width), lambda i: (i, 0)),
            ],
            out_specs=pl.BlockSpec((tile_rows, width), lambda i: (i, 0)),
        ),
        compiler_params=pltpu.CompilerParams(
            dimension_semantics=("parallel",),
            vmem_limit_bytes=_VMEM_LIMIT_BYTES,
        ),
    )(x2, y2)


def res_gate(x: jax.Array, y: jax.Array) -> jax.Array:
    """Pallas implementation of ResGate.forward: x + y (same shape/dtype)."""
    assert x.shape == y.shape and x.dtype == y.dtype
    orig_shape = x.shape
    total = int(math.prod(orig_shape)) if orig_shape else 1
    itemsize = x.dtype.itemsize

    if total % _LANE == 0:
        # Fast path: reshape the whole element count into a lane-dense
        # (rows, W) slab where W is the widest multiple of 128 (<= 8192) that
        # exactly divides `total` -- no padding, and a reshape of a contiguous
        # row-major array is free. Wide W -> unmasked full-width stores.
        width = _LANE
        while width * 2 <= _MAX_LANE_WIDTH and total % (width * 2) == 0:
            width *= 2
        rows = total // width
        x2 = x.reshape(rows, width)
        y2 = y.reshape(rows, width)
        tile_rows = _pick_tile_rows(rows, width, itemsize)
        return _add_2d(x2, y2, tile_rows).reshape(orig_shape)

    width = orig_shape[-1] if x.ndim >= 1 else 1
    if 0 < width <= _MAX_LANE_WIDTH:
        # Odd element count but modest last dim: keep the trailing dim as the
        # lane dim (block covers the full last dim, so the (8,128) rule is met
        # via "equals the full array dim"). No padding copy; stores may be
        # masked but this path only triggers for non-128-aligned totals.
        rows = total // width
        x2 = x.reshape(rows, width)
        y2 = y.reshape(rows, width)
        tile_rows = _pick_tile_rows(rows, width, itemsize)
        return _add_2d(x2, y2, tile_rows).reshape(orig_shape)

    # Pathological fallback (huge, non-128-divisible last dim): pad the flat
    # view up to a lane-dense multiple, add, then slice back. Costs one extra
    # HBM pass but keeps every block VMEM-sized and lane-aligned.
    width = _LANE * _sublane(itemsize)
    padded = pl.cdiv(total, width) * width
    xf = jnp.pad(x.reshape(-1), (0, padded - total))
    yf = jnp.pad(y.reshape(-1), (0, padded - total))
    rows = padded // width
    tile_rows = _pick_tile_rows(rows, width, itemsize)
    out = _add_2d(xf.reshape(rows, width), yf.reshape(rows, width), tile_rows)
    return out.reshape(-1)[:total].reshape(orig_shape)


if __name__ == "__main__":
    # ResGate has no parameters (its __init__ defines none).
    key = jax.random.PRNGKey(0)
    kx, ky = jax.random.split(key)

    # DTQN-style (batch, seq, hidden) activations.
    batch, seq, hidden = 2, 8, 32
    x = jax.random.normal(kx, (batch, seq, hidden), dtype=jnp.float32)
    y = jax.random.normal(ky, (batch, seq, hidden), dtype=jnp.float32)

    out = jax.block_until_ready(res_gate(x, y))
    ref = x + y
    assert out.shape == ref.shape and out.dtype == ref.dtype
    assert jnp.allclose(out, ref, atol=1e-6, rtol=1e-6)

    # Odd-shape fallback path (total not a multiple of 128).
    xo = jax.random.normal(kx, (2, 7, 33), dtype=jnp.float32)
    yo = jax.random.normal(ky, (2, 7, 33), dtype=jnp.float32)
    outo = jax.block_until_ready(res_gate(xo, yo))
    assert jnp.allclose(outo, xo + yo, atol=1e-6, rtol=1e-6)

    # bf16 exercises sublane packing (16 rows / vreg) in tile-size selection.
    xb = x.astype(jnp.bfloat16)
    yb = y.astype(jnp.bfloat16)
    outb = jax.block_until_ready(res_gate(xb, yb))
    assert outb.dtype == jnp.bfloat16
    assert jnp.allclose(outb.astype(jnp.float32),
                        (xb + yb).astype(jnp.float32), atol=1e-2, rtol=1e-2)

    print("KERNEL_OK")
</pallas_src>

<mosaic_0001>
module attributes {stable_mosaic.version = 11 : i64} {
  func.func @_res_gate_kernel(%arg0: i32, %arg1: memref<1x512xf32, #tpu.memory_space<vmem>>, %arg2: memref<1x512xf32, #tpu.memory_space<vmem>>, %arg3: memref<1x512xf32, #tpu.memory_space<vmem>>) attributes {dimension_semantics = [#tpu.dimension_semantics<parallel>], iteration_bounds = array<i64: 1>, scalar_prefetch = 0 : i64, scratch_operands = 0 : i64, tpu.core_type = #tpu.core_type<tc>, window_params = [{transform_indices = @transform_0, window_bounds = array<i64: 1, 512>}, {transform_indices = @transform_1, window_bounds = array<i64: 1, 512>}, {transform_indices = @transform_2, window_bounds = array<i64: 1, 512>}]} {
    %c0 = arith.constant 0 : index
    %c0_0 = arith.constant 0 : index
    %0 = vector.load %arg1[%c0, %c0_0] : memref<1x512xf32, #tpu.memory_space<vmem>>, vector<1x512xf32>
    %c0_1 = arith.constant 0 : index
    %c0_2 = arith.constant 0 : index
    %1 = vector.load %arg2[%c0_1, %c0_2] : memref<1x512xf32, #tpu.memory_space<vmem>>, vector<1x512xf32>
    %2 = arith.addf %0, %1 : vector<1x512xf32>
    %c0_3 = arith.constant 0 : index
    %c0_4 = arith.constant 0 : index
    %3 = vector.load %arg3[%c0_3, %c0_4] : memref<1x512xf32, #tpu.memory_space<vmem>>, vector<1x512xf32>
    tpu.vector_store %arg3[%c0_3, %c0_4], %2 {strides = array<i32>} : memref<1x512xf32, #tpu.memory_space<vmem>>, vector<1x512xf32>,
    return
  }
  func.func @transform_0(%arg0: i32) -> (i32, i32) {
    %c0_i32 = arith.constant 0 : i32
    %c0_i32_0 = arith.constant 0 : i32
    return %arg0, %c0_i32 : i32, i32
  }
  func.func @transform_1(%arg0: i32) -> (i32, i32) {
    %c0_i32 = arith.constant 0 : i32
    %c0_i32_0 = arith.constant 0 : i32
    return %arg0, %c0_i32 : i32, i32
  }
  func.func @transform_2(%arg0: i32) -> (i32, i32) {
    %c0_i32 = arith.constant 0 : i32
    %c0_i32_0 = arith.constant 0 : i32
    return %arg0, %c0_i32 : i32, i32
  }
}

</mosaic_0001>

<bundles_post_ra>
// kernel: tpu_custom_call.1
= control target key start
LH: loop header
LB: loop body
LE: loop exit
PB: predicated region body
PF: predicated region fallthrough
CT: control target
= control target key end

     0   :  { %7 = vsyncpa [#allocation3], 0  ;;  %s189_s0 = inlined_call_operand.hbm [shape: f32[1,512], index: 0, kind: input, shape index: {}]   ;;  %s190_s1 = inlined_call_operand.hbm [shape: f32[1,512], index: 1, kind: input, shape index: {}]   ;;  %s191_s2 = inlined_call_operand.hbm [shape: f32[1,512], index: 2, kind: output, shape index: {}]  }
   0x1   :  { %8 = vsyncpa [#allocation6], 0 }
   0x2   :  { %9 = vsyncpa [#allocation4], 0  ;;  %s135_s9 = smov [#allocation2]   ;;  %s136_s11 = smov [#allocation5]  }
   0x3   :  { %s16_s10 = sshll.u32 %s135_s9, 4  ;;  %s26_s12 = sshll.u32 %s136_s11, 4  ;;  %s17_s10 = int_to_ptr.vmem [resolvable:$true] %s16_s10  ;;  %s27_s12 = int_to_ptr.vmem [resolvable:$true] %s26_s12 }
   0x4   :  { %s63_s15 = scalar_lea.hbm %s189_s0, 64 }
   0x5   :  { %p64_p0 = scmp.ne.s32.totalorder %s189_s0, %s63_s15  ;;  %p67_p1 = scmp.lt.u32.totalorder %s63_s15, %s189_s0 }
   0x7   :  { %p69_p2 = pnand %p67_p1, %p64_p0 }
   0x9   :  { %72 = shalt.err (!%p69_p2)
}
   0xa   :  { %s73_s20 = scalar_lea.vmem %s17_s10, 64  ;;  %p78_p4 = scmp.lt.s32.totalorder %s17_s10, %s17_s10 }
   0xb   :  { %p74_p3 = scmp.ne.s32.totalorder %s17_s10, %s73_s20  ;;  %p79_p5 = scmp.lt.s32.totalorder %s73_s20, %s73_s20 }
   0xd   :  { %p80_p6 = por %p79_p5, %p78_p4 }
   0xf   :  { %p81_p7 = pnand %p80_p6, %p74_p3 }
  0x11   :  { %84 = shalt.err (!%p81_p7)
}
  0x12   :  { %19 = dma.hbm_to_vmem [thread:$0]  %s189_s0, 64, %s17_s10, [#allocation3]  }
  0x13   :  { %s85_s25 = scalar_lea.hbm %s190_s1, 64 }
  0x14   :  { %p86_p8 = scmp.ne.s32.totalorder %s190_s1, %s85_s25  ;;  %p89_p9 = scmp.lt.u32.totalorder %s85_s25, %s190_s1 }
  0x16   :  { %p91_p10 = pnand %p89_p9, %p86_p8 }
  0x18   :  { %94 = shalt.err (!%p91_p10)
}
  0x19   :  { %s95_s30 = scalar_lea.vmem %s27_s12, 64  ;;  %p100_p12 = scmp.lt.s32.totalorder %s27_s12, %s27_s12 }
  0x1a   :  { %p96_p11 = scmp.ne.s32.totalorder %s27_s12, %s95_s30  ;;  %p101_p13 = scmp.lt.s32.totalorder %s95_s30, %s95_s30 }
  0x1c   :  { %p102_p0 = por %p101_p13, %p100_p12 }
  0x1e   :  { %p103_p1 = pnand %p102_p0, %p96_p11 }
  0x20   :  { %106 = shalt.err (!%p103_p1)
}
  0x21   :  { %29 = dma.hbm_to_vmem [thread:$0]  %s190_s1, 64, %s27_s12, [#allocation6]  }
  0x22   :  { %129 = dma.done.wait [#allocation3], 64  }
  0x23   :  { %130 = vsyncadd [#allocation3], 4294967232 }
  0x24   :  { %131 = dma.done.wait [#allocation6], 64  }
  0x25   :  { %132 = vsyncadd [#allocation6], 4294967232  ;;  %v39_v0 = vlaneseq  ;;  %s137_s4 = smov [#allocation7]   ;;  %v36_v1 = vld [vmem:[#allocation2] sm:$0xf] }
  0x26   :  { %s50_s5 = sshll.u32 %s137_s4, 4  ;;  %v37_v2 = vld [vmem:[#allocation5] sm:$0xf]  ;;  %s51_s5 = int_to_ptr.vmem [resolvable:$true] %s50_s5 }
  0x27   :  { %vm41_vm0 = vcmp.lt.s32.totalorder %v39_v0, 512  ;;  %v38_v3 = vadd.f32 %v37_v2, %v36_v1  ;;  %s107_s6 = scalar_lea.vmem %s51_s5, 64  ;;  %p112_p3 = scmp.lt.s32.totalorder %s51_s5, %s51_s5 }
  0x28   :  { %p108_p2 = scmp.ne.s32.totalorder %s51_s5, %s107_s6  ;;  %p113_p4 = scmp.lt.s32.totalorder %s107_s6, %s107_s6 }
  0x29   :  { %43 = vst.msk [vmem:[#allocation7] sm:$0xf] %vm41_vm0, %v38_v3 }
  0x2a   :  { %p114_p5 = por %p113_p4, %p112_p3 }
  0x2c   :  { %p115_p6 = pnand %p114_p5, %p108_p2 }
  0x2e   :  { %118 = shalt.err (!%p115_p6)
}
  0x2f   :  { %s119_s8 = scalar_lea.hbm %s191_s2, 64 }
  0x30   :  { %p120_p7 = scmp.ne.s32.totalorder %s191_s2, %s119_s8  ;;  %p123_p8 = scmp.lt.u32.totalorder %s119_s8, %s191_s2 }
  0x32   :  { %p125_p9 = pnand %p123_p8, %p120_p7 }
  0x34   :  { %128 = shalt.err (!%p125_p9)
}
  0x35   :  { %53 = dma.vmem_to_hbm [thread:$0]  %s51_s5, 64, %s191_s2, [#allocation4]  }
  0x36   :  { %133 = dma.done.wait [#allocation4], 64  }
  0x37   :  { %134 = vsyncadd [#allocation4], 4294967232 }
  0x38   :  { %57 = vsyncpa [#allocation3], 1 }
  0x39   :  { %58 = vsyncpa [#allocation6], 1 }
  0x3a   :  { %59 = vsyncpa [#allocation4], 1 }

</bundles_post_ra>
